<compile_context>
chip_gen: v6e
topology: v6e:2x2x1
jax: 0.10.0
libtpu: 0.0.40
codegen_flags: <defaults>
</compile_context>

<pallas_src>
import jax
import jax.numpy as jnp
from jax.experimental import pallas as pl
from jax.experimental.pallas import tpu as pltpu


def _critic_kernel(s_ref, a_ref, w1s_ref, w1a_ref, b1_ref,
                   w2_ref, b2_ref, w3_ref, b3_ref, out_ref):
    compute = jnp.bfloat16
    s = s_ref[...].astype(compute)                       # (T, state_dim)
    a = a_ref[...].astype(compute)                       # (T, action_dim)

    # Layer 1: fused concat -> two matmuls, f32 accumulate on the MXU.
    h1 = (jnp.dot(s, w1s_ref[...].astype(compute), preferred_element_type=jnp.float32)
          + jnp.dot(a, w1a_ref[...].astype(compute), preferred_element_type=jnp.float32)
          + b1_ref[...])
    h1 = jnp.maximum(h1, 0.0)                            # f32 ReLU (v5e-safe)

    # Layer 2.
    h2 = jnp.dot(h1.astype(compute), w2_ref[...].astype(compute),
                 preferred_element_type=jnp.float32) + b2_ref[...]
    h2 = jnp.maximum(h2, 0.0)

    # Output layer: contract the hidden axis of h2 (T, H) with w3 stored as (1, H) so
    # the result is (1, T): batch on the lane axis -> lane-dense, unmasked store.
    q = jax.lax.dot_general(w3_ref[...].astype(compute), h2.astype(compute),
                            dimension_numbers=(((1,), (1,)), ((), ())),
                            preferred_element_type=jnp.float32)
    out_ref[...] = (q + b3_ref[...]).astype(out_ref.dtype)


def _round_up(x, m):
    return ((x + m - 1) // m) * m


def critic_forward(state, action, params, *, max_tile_b=512):
    """state: (B, state_dim), action: (B, action_dim) -> (B, 1) Q-value."""
    w1_s, w1_a, b1, w2, b2, w3, b3 = params
    B, state_dim = state.shape
    action_dim = action.shape[1]
    H = w2.shape[0]

    # Batch tile: multiple of 128 (lane-dense output) and of 8 (sublanes), capped.
    tile_b = min(max_tile_b, _round_up(B, 128))
    b_pad = _round_up(B, tile_b)
    if b_pad != B:
        state = jnp.pad(state, ((0, b_pad - B), (0, 0)))
        action = jnp.pad(action, ((0, b_pad - B), (0, 0)))

    grid = (b_pad // tile_b,)

    d_in = state_dim + action_dim
    cost = pl.CostEstimate(
        flops=2 * b_pad * (d_in * H + H * H + H),
        transcendentals=0,
        bytes_accessed=4 * (b_pad * (d_in + 1) + d_in * H + H * H + 3 * H + 1),
    )

    def resident(shape):
        return pl.BlockSpec(shape, lambda i: (0, 0))      # stays in VMEM across tiles

    out_row = pl.pallas_call(
        _critic_kernel,
        out_shape=jax.ShapeDtypeStruct((1, b_pad), jnp.float32),
        grid=grid,
        in_specs=[
            pl.BlockSpec((tile_b, state_dim), lambda i: (i, 0)),
            pl.BlockSpec((tile_b, action_dim), lambda i: (i, 0)),
            resident((state_dim, H)),
            resident((action_dim, H)),
            resident((1, H)),
            resident((H, H)),
            resident((1, H)),
            resident((1, H)),      # w3 stored as (1, H) (torch layout)
            resident((1, 1)),
        ],
        out_specs=pl.BlockSpec((1, tile_b), lambda i: (0, i)),
        compiler_params=pltpu.CompilerParams(
            dimension_semantics=("parallel",),
            vmem_limit_bytes=32 * 1024 * 1024,
        ),
        cost_estimate=cost,
    )(state, action, w1_s, w1_a, b1, w2, b2, w3, b3)

    return jnp.reshape(out_row[:, :B], (B, 1))


def init_critic_params(key, state_dim, action_dim, layer_neurons):
    """Mirror torch.nn.Linear's U(-1/sqrt(fan_in), 1/sqrt(fan_in)) init.

    W1 is returned split into (state_dim, H) and (action_dim, H) halves so the
    concat can be fused into the kernel.  W3 is stored as (1, H); biases as rows.
    """
    d_in = state_dim + action_dim
    ks = jax.random.split(key, 6)

    def lin(kw, kb, fan_in, w_shape, b_shape):
        bound = 1.0 / (fan_in ** 0.5)
        w = jax.random.uniform(kw, w_shape, jnp.float32, -bound, bound)
        b = jax.random.uniform(kb, b_shape, jnp.float32, -bound, bound)
        return w, b

    w1, b1 = lin(ks[0], ks[1], d_in, (d_in, layer_neurons), (1, layer_neurons))
    w1_s, w1_a = w1[:state_dim], w1[state_dim:]
    w2, b2 = lin(ks[2], ks[3], layer_neurons, (layer_neurons, layer_neurons), (1, layer_neurons))
    w3, b3 = lin(ks[4], ks[5], layer_neurons, (1, layer_neurons), (1, 1))
    return (w1_s, w1_a, b1, w2, b2, w3, b3)


if __name__ == "__main__":
    key = jax.random.PRNGKey(0)
    k_state, k_action, k_params = jax.random.split(key, 3)

    # Small shapes consistent with the module: input_shape=(16,), action_dim=4,
    # layer_neurons=32, batch=2.
    batch, state_dim, action_dim, layer_neurons = 2, 16, 4, 32

    state = jax.random.normal(k_state, (batch, state_dim), jnp.float32)
    action = jax.random.normal(k_action, (batch, action_dim), jnp.float32)
    params = init_critic_params(k_params, state_dim, action_dim, layer_neurons)

    q = critic_forward(state, action, params)
    jax.block_until_ready(q)

    # Pure-JAX f32 reference of the same MLP (kernel uses bf16 MXU inputs with f32
    # accumulation, so the tolerance is loosened accordingly).
    w1_s, w1_a, b1, w2, b2, w3, b3 = params
    x = jnp.concatenate([state, action], axis=1)
    w1 = jnp.concatenate([w1_s, w1_a], axis=0)
    ref = jnp.maximum(x @ w1 + b1, 0.0)
    ref = jnp.maximum(ref @ w2 + b2, 0.0)
    ref = ref @ w3.T + b3

    assert q.shape == (batch, 1)
    assert jnp.allclose(q, ref, atol=5e-2, rtol=5e-2), "mismatch vs reference"

    print("KERNEL_OK")
</pallas_src>

<mosaic_0001>
module attributes {stable_mosaic.version = 11 : i64} {
  func.func @_critic_kernel(%arg0: i32, %arg1: memref<128x16xf32, #tpu.memory_space<vmem>>, %arg2: memref<128x4xf32, #tpu.memory_space<vmem>>, %arg3: memref<16x32xf32, #tpu.memory_space<vmem>>, %arg4: memref<4x32xf32, #tpu.memory_space<vmem>>, %arg5: memref<1x32xf32, #tpu.memory_space<vmem>>, %arg6: memref<32x32xf32, #tpu.memory_space<vmem>>, %arg7: memref<1x32xf32, #tpu.memory_space<vmem>>, %arg8: memref<1x32xf32, #tpu.memory_space<vmem>>, %arg9: memref<1x1xf32, #tpu.memory_space<vmem>>, %arg10: memref<1x128xf32, #tpu.memory_space<vmem>>) attributes {dimension_semantics = [#tpu.dimension_semantics<parallel>], iteration_bounds = array<i64: 1>, scalar_prefetch = 0 : i64, scratch_operands = 0 : i64, tpu.core_type = #tpu.core_type<tc>, window_params = [{transform_indices = @transform_0, window_bounds = array<i64: 128, 16>}, {transform_indices = @transform_1, window_bounds = array<i64: 128, 4>}, {pipeline_mode = #tpu.pipeline_mode<synchronous>, transform_indices = @transform_2, window_bounds = array<i64: 16, 32>}, {pipeline_mode = #tpu.pipeline_mode<synchronous>, transform_indices = @transform_3, window_bounds = array<i64: 4, 32>}, {pipeline_mode = #tpu.pipeline_mode<synchronous>, transform_indices = @transform_4, window_bounds = array<i64: 1, 32>}, {pipeline_mode = #tpu.pipeline_mode<synchronous>, transform_indices = @transform_5, window_bounds = array<i64: 32, 32>}, {pipeline_mode = #tpu.pipeline_mode<synchronous>, transform_indices = @transform_6, window_bounds = array<i64: 1, 32>}, {pipeline_mode = #tpu.pipeline_mode<synchronous>, transform_indices = @transform_7, window_bounds = array<i64: 1, 32>}, {pipeline_mode = #tpu.pipeline_mode<synchronous>, transform_indices = @transform_8, window_bounds = array<i64: 1, 1>}, {transform_indices = @transform_9, window_bounds = array<i64: 1, 128>}]} {
    %c0 = arith.constant 0 : index
    %c0_0 = arith.constant 0 : index
    %0 = vector.load %arg1[%c0, %c0_0] : memref<128x16xf32, #tpu.memory_space<vmem>>, vector<128x16xf32>
    %1 = arith.truncf %0 : vector<128x16xf32> to vector<128x16xbf16>
    %c0_1 = arith.constant 0 : index
    %c0_2 = arith.constant 0 : index
    %2 = vector.load %arg2[%c0_1, %c0_2] : memref<128x4xf32, #tpu.memory_space<vmem>>, vector<128x4xf32>
    %3 = arith.truncf %2 : vector<128x4xf32> to vector<128x4xbf16>
    %c0_3 = arith.constant 0 : index
    %c0_4 = arith.constant 0 : index
    %4 = vector.load %arg3[%c0_3, %c0_4] : memref<16x32xf32, #tpu.memory_space<vmem>>, vector<16x32xf32>
    %5 = arith.truncf %4 : vector<16x32xf32> to vector<16x32xbf16>
    %cst = arith.constant dense<0.000000e+00> : vector<128x32xf32>
    %6 = tpu.matmul %1, %5, %cst {dimension_numbers = #tpu.dot_dimension_numbers<[1], [0], [0], [1], [0, 0, 1, 1], [], []>} : vector<128x16xbf16>, vector<16x32xbf16>, vector<128x32xf32> -> vector<128x32xf32>
    %c0_5 = arith.constant 0 : index
    %c0_6 = arith.constant 0 : index
    %7 = vector.load %arg4[%c0_5, %c0_6] : memref<4x32xf32, #tpu.memory_space<vmem>>, vector<4x32xf32>
    %8 = arith.truncf %7 : vector<4x32xf32> to vector<4x32xbf16>
    %cst_7 = arith.constant dense<0.000000e+00> : vector<128x32xf32>
    %9 = tpu.matmul %3, %8, %cst_7 {dimension_numbers = #tpu.dot_dimension_numbers<[1], [0], [0], [1], [0, 0, 1, 1], [], []>} : vector<128x4xbf16>, vector<4x32xbf16>, vector<128x32xf32> -> vector<128x32xf32>
    %10 = arith.addf %6, %9 : vector<128x32xf32>
    %c0_8 = arith.constant 0 : index
    %c0_9 = arith.constant 0 : index
    %11 = vector.load %arg5[%c0_8, %c0_9] : memref<1x32xf32, #tpu.memory_space<vmem>>, vector<1x32xf32>
    %12 = vector.broadcast %11 : vector<1x32xf32> to vector<128x32xf32>
    %13 = arith.addf %10, %12 : vector<128x32xf32>
    %cst_10 = arith.constant 0.000000e+00 : f32
    %14 = vector.broadcast %cst_10 : f32 to vector<128x32xf32>
    %15 = arith.maximumf %13, %14 : vector<128x32xf32>
    %16 = arith.truncf %15 : vector<128x32xf32> to vector<128x32xbf16>
    %c0_11 = arith.constant 0 : index
    %c0_12 = arith.constant 0 : index
    %17 = vector.load %arg6[%c0_11, %c0_12] : memref<32x32xf32, #tpu.memory_space<vmem>>, vector<32x32xf32>
    %18 = arith.truncf %17 : vector<32x32xf32> to vector<32x32xbf16>
    %cst_13 = arith.constant dense<0.000000e+00> : vector<128x32xf32>
    %19 = tpu.matmul %16, %18, %cst_13 {dimension_numbers = #tpu.dot_dimension_numbers<[1], [0], [0], [1], [0, 0, 1, 1], [], []>} : vector<128x32xbf16>, vector<32x32xbf16>, vector<128x32xf32> -> vector<128x32xf32>
    %c0_14 = arith.constant 0 : index
    %c0_15 = arith.constant 0 : index
    %20 = vector.load %arg7[%c0_14, %c0_15] : memref<1x32xf32, #tpu.memory_space<vmem>>, vector<1x32xf32>
    %21 = vector.broadcast %20 : vector<1x32xf32> to vector<128x32xf32>
    %22 = arith.addf %19, %21 : vector<128x32xf32>
    %cst_16 = arith.constant 0.000000e+00 : f32
    %23 = vector.broadcast %cst_16 : f32 to vector<128x32xf32>
    %24 = arith.maximumf %22, %23 : vector<128x32xf32>
    %c0_17 = arith.constant 0 : index
    %c0_18 = arith.constant 0 : index
    %25 = vector.load %arg8[%c0_17, %c0_18] : memref<1x32xf32, #tpu.memory_space<vmem>>, vector<1x32xf32>
    %26 = arith.truncf %25 : vector<1x32xf32> to vector<1x32xbf16>
    %27 = arith.truncf %24 : vector<128x32xf32> to vector<128x32xbf16>
    %cst_19 = arith.constant dense<0.000000e+00> : vector<1x128xf32>
    %28 = tpu.matmul %26, %27, %cst_19 {dimension_numbers = #tpu.dot_dimension_numbers<[1], [1], [0], [0], [0, 0, 1, 0], [], []>} : vector<1x32xbf16>, vector<128x32xbf16>, vector<1x128xf32> -> vector<1x128xf32>
    %c0_20 = arith.constant 0 : index
    %c0_21 = arith.constant 0 : index
    %29 = vector.load %arg9[%c0_20, %c0_21] : memref<1x1xf32, #tpu.memory_space<vmem>>, vector<1x1xf32>
    %30 = vector.broadcast %29 : vector<1x1xf32> to vector<1x128xf32>
    %31 = arith.addf %28, %30 : vector<1x128xf32>
    %c0_22 = arith.constant 0 : index
    %c0_23 = arith.constant 0 : index
    %32 = vector.load %arg10[%c0_22, %c0_23] : memref<1x128xf32, #tpu.memory_space<vmem>>, vector<1x128xf32>
    tpu.vector_store %arg10[%c0_22, %c0_23], %31 {strides = array<i32>} : memref<1x128xf32, #tpu.memory_space<vmem>>, vector<1x128xf32>,
    return
  }
  func.func @transform_0(%arg0: i32) -> (i32, i32) {
    %c0_i32 = arith.constant 0 : i32
    %c0_i32_0 = arith.constant 0 : i32
    return %arg0, %c0_i32 : i32, i32
  }
  func.func @transform_1(%arg0: i32) -> (i32, i32) {
    %c0_i32 = arith.constant 0 : i32
    %c0_i32_0 = arith.constant 0 : i32
    return %arg0, %c0_i32 : i32, i32
  }
  func.func @transform_2(%arg0: i32) -> (i32, i32) {
    %c0_i32 = arith.constant 0 : i32
    %c0_i32_0 = arith.constant 0 : i32
    %c0_i32_1 = arith.constant 0 : i32
    return %c0_i32, %c0_i32_0 : i32, i32
  }
  func.func @transform_3(%arg0: i32) -> (i32, i32) {
    %c0_i32 = arith.constant 0 : i32
    %c0_i32_0 = arith.constant 0 : i32
    %c0_i32_1 = arith.constant 0 : i32
    return %c0_i32, %c0_i32_0 : i32, i32
  }
  func.func @transform_4(%arg0: i32) -> (i32, i32) {
    %c0_i32 = arith.constant 0 : i32
    %c0_i32_0 = arith.constant 0 : i32
    %c0_i32_1 = arith.constant 0 : i32
    return %c0_i32, %c0_i32_0 : i32, i32
  }
  func.func @transform_5(%arg0: i32) -> (i32, i32) {
    %c0_i32 = arith.constant 0 : i32
    %c0_i32_0 = arith.constant 0 : i32
    %c0_i32_1 = arith.constant 0 : i32
    return %c0_i32, %c0_i32_0 : i32, i32
  }
  func.func @transform_6(%arg0: i32) -> (i32, i32) {
    %c0_i32 = arith.constant 0 : i32
    %c0_i32_0 = arith.constant 0 : i32
    %c0_i32_1 = arith.constant 0 : i32
    return %c0_i32, %c0_i32_0 : i32, i32
  }
  func.func @transform_7(%arg0: i32) -> (i32, i32) {
    %c0_i32 = arith.constant 0 : i32
    %c0_i32_0 = arith.constant 0 : i32
    %c0_i32_1 = arith.constant 0 : i32
    return %c0_i32, %c0_i32_0 : i32, i32
  }
  func.func @transform_8(%arg0: i32) -> (i32, i32) {
    %c0_i32 = arith.constant 0 : i32
    %c0_i32_0 = arith.constant 0 : i32
    %c0_i32_1 = arith.constant 0 : i32
    return %c0_i32, %c0_i32_0 : i32, i32
  }
  func.func @transform_9(%arg0: i32) -> (i32, i32) {
    %c0_i32 = arith.constant 0 : i32
    %c0_i32_0 = arith.constant 0 : i32
    return %c0_i32, %arg0 : i32, i32
  }
}

</mosaic_0001>

<bundles_post_ra>
// kernel: tpu_custom_call.1
= control target key start
LH: loop header
LB: loop body
LE: loop exit
PB: predicated region body
PF: predicated region fallthrough
CT: control target
= control target key end

     0   :  { %s1071_s0 = inlined_call_operand.vmem [shape: f32[128,16], index: 0, kind: input, shape index: {}]   ;;  %s1072_s1 = inlined_call_operand.vmem [shape: f32[128,4], index: 1, kind: input, shape index: {}]   ;;  %s1073_s2 = inlined_call_operand.vmem [shape: f32[16,32], index: 2, kind: input, shape index: {}]   ;;  %s1074_s3 = inlined_call_operand.vmem [shape: f32[4,32], index: 3, kind: input, shape index: {}]   ;;  %s1075_s4 = inlined_call_operand.vmem [shape: f32[1,32], index: 4, kind: input, shape index: {}]   ;;  %s1076_s5 = inlined_call_operand.vmem [shape: f32[32,32], index: 5, kind: input, shape index: {}]   ;;  %s1077_s6 = inlined_call_operand.vmem [shape: f32[1,32], index: 6, kind: input, shape index: {}]   ;;  %s1078_s7 = inlined_call_operand.vmem [shape: f32[1,32], index: 7, kind: input, shape index: {}]   ;;  %s1079_s8 = inlined_call_operand.<no memory space> [shape: f32[1,1], index: 8, kind: input, shape index: {}]   ;;  %s1080_s9 = inlined_call_operand.hbm [shape: f32[1,128], index: 9, kind: output, shape index: {}]  }
   0x1   :  { %v14_v0 = vstv %s1079_s8 }
   0x2   :  { %15 = vst [vmem:[#allocation2] sm:$0x1] %v14_v0 }
   0x3   :  { %v87_v1 = vld [vmem:[%s1074_s3] sm:$0xf]  ;;  %vm114_vm0 = vcmask 1041408   ;;  %v85_v3 = vld [vmem:[%s1073_s2 + $0x8] sm:$0xff]  ;;  %vm89_vm1 = vcmask 31744   ;;  %vm215_vm2 = vcmask 130048  }
   0x4   :  { %v84_v2 = vld [vmem:[%s1073_s2] sm:$0xff]  ;;  %v88_v4 = vpack.c.bf16 %v87_v1, %v87_v1  ;;  %v61_v7 = vld [vmem:[%s1072_s1 + $0x8] sm:$0xff]  ;;  %v62_v11 = vld [vmem:[%s1072_s1 + $0x10] sm:$0xff] }
   0x5   :  { %v86_v5 = vpack.c.bf16 %v85_v3, %v84_v2  ;;  %v60_v6 = vld [vmem:[%s1072_s1] sm:$0xff]  ;;  %v37_v10 = vld [vmem:[%s1071_s0 + $0x8] sm:$0xff]  ;;  %v63_v12 = vld [vmem:[%s1072_s1 + $0x18] sm:$0xff] }
   0x6   :  { %v36_v8 = vld [vmem:[%s1071_s0] sm:$0xff]  ;;  %v76_v9 = vpack.c.bf16 %v61_v7, %v60_v6  ;;  %777 = vmatprep.subr.msk.bf16.mxu0 %vm114_vm0, %v88_v4  ;;  %v116_v13 = vsel %vm114_vm0, %v88_v4, 0  ;;  %v77_v15 = vpack.c.bf16 %v63_v12, %v62_v11  ;;  %v38_v16 = vld [vmem:[%s1071_s0 + $0x10] sm:$0xff]  ;;  %v39_v17 = vld [vmem:[%s1071_s0 + $0x18] sm:$0xff] }
   0x7   :  { %719 = vmatprep.subr.bf16.mxu1 %v86_v5  ;;  %v52_v14 = vpack.c.bf16 %v37_v10, %v36_v8  ;;  %v64_v18 = vld [vmem:[%s1072_s1 + $0x20] sm:$0xff]  ;;  %702 = vmatpush3.bf16.msra.mxu0 %v116_v13  ;;  %v53_v19 = vpack.c.bf16 %v39_v17, %v38_v16  ;;  %v65_v20 = vld [vmem:[%s1072_s1 + $0x28] sm:$0xff]  ;;  %v66_v25 = vld [vmem:[%s1072_s1 + $0x30] sm:$0xff] }
   0x8   :  { %720 = vmatpush3.bf16.msra.mxu1 %v86_v5  ;;  %v40_v21 = vld [vmem:[%s1071_s0 + $0x20] sm:$0xff]  ;;  %v41_v22 = vld [vmem:[%s1071_s0 + $0x28] sm:$0xff]  ;;  %703 = vmatprep.mubr.msk.bf16.mxu0 %vm89_vm1, %v76_v9  ;;  %v78_v23 = vpack.c.bf16 %v65_v20, %v64_v18  ;;  %v67_v26 = vld [vmem:[%s1072_s1 + $0x38] sm:$0xff] }
   0x9   :  { %721 = vmatprep.mubr.msk.bf16.mxu1 %vm215_vm2, %v52_v14  ;;  %v54_v24 = vpack.c.bf16 %v41_v22, %v40_v21  ;;  %v42_v27 = vld [vmem:[%s1071_s0 + $0x30] sm:$0xff]  ;;  %v43_v28 = vld [vmem:[%s1071_s0 + $0x38] sm:$0xff]  ;;  %v68_v29 = vld [vmem:[%s1072_s1 + $0x40] sm:$0xff]  ;;  %v79_v33 = vpack.c.bf16 %v67_v26, %v66_v25 }
   0xa   :  { %704 = vmatmul.mubr.msk.bf16.vlgmr.msra.gmra.mxu0 %vm89_vm1, %v77_v15  ;;  %v69_v30 = vld [vmem:[%s1072_s1 + $0x48] sm:$0xff]  ;;  %v44_v31 = vld [vmem:[%s1071_s0 + $0x40] sm:$0xff]  ;;  %v55_v34 = vpack.c.bf16 %v43_v28, %v42_v27  ;;  %v386_v35 = vld [vmem:[%s1076_s5 + $0x10] sm:$0xff] }
   0xb   :  { %722 = vmatmul.mubr.msk.bf16.vlgmr.msra.gmra.mxu1 %vm215_vm2, %v53_v19  ;;  %707 = vmatprep.mubr.msk.bf16.mxu0 %vm89_vm1, %v78_v23  ;;  %v45_v32 = vld [vmem:[%s1071_s0 + $0x48] sm:$0xff]  ;;  %v80_v36 = vpack.c.bf16 %v69_v30, %v68_v29  ;;  %v387_v38 = vld [vmem:[%s1076_s5 + $0x18] sm:$0xff]  ;;  %v384_v39 = vld [vmem:[%s1076_s5] sm:$0xff] }
   0xc   :  { %725 = vmatprep.mubr.msk.bf16.mxu1 %vm215_vm2, %v54_v24  ;;  %v56_v37 = vpack.c.bf16 %v45_v32, %v44_v31  ;;  %v385_v40 = vld [vmem:[%s1076_s5 + $0x8] sm:$0xff]  ;;  %v389_v41 = vpack.c.bf16 %v387_v38, %v386_v35 }
   0xd   :  { %16 = vsyncpa [#allocation4], 0  ;;  %v70_v42 = vld [vmem:[%s1072_s1 + $0x50] sm:$0xff]  ;;  %v71_v43 = vld [vmem:[%s1072_s1 + $0x58] sm:$0xff]  ;;  %v388_v44 = vpack.c.bf16 %v385_v40, %v384_v39  ;;  %vm397_vm3 = vcmask 261120   ;;  %vm806_vm4 = vmmov 0  }
   0xe   :  { %v46_v45 = vld [vmem:[%s1071_s0 + $0x50] sm:$0xff]  ;;  %v47_v46 = vld [vmem:[%s1071_s0 + $0x58] sm:$0xff]  ;;  %v72_v47 = vld [vmem:[%s1072_s1 + $0x60] sm:$0xff]  ;;  %737 = vmatprep.subr.bf16.mxu0 %v389_v41  ;;  %v81_v51 = vpack.c.bf16 %v71_v43, %v70_v42  ;;  %s808_s18 = smov [#allocation3]  }
   0xf   :  { %v73_v48 = vld [vmem:[%s1072_s1 + $0x68] sm:$0xff]  ;;  %v48_v49 = vld [vmem:[%s1071_s0 + $0x60] sm:$0xff]  ;;  %738 = vmatpush3.bf16.msra.mxu0 %v389_v41  ;;  %v57_v52 = vpack.c.bf16 %v47_v46, %v46_v45  ;;  %v74_v55 = vld [vmem:[%s1072_s1 + $0x70] sm:$0xff]  ;;  %s629_s8 = sshll.u32 %s808_s18, 4  ;;  %s630_s8 = int_to_ptr.vmem [resolvable:$true] %s629_s8 }
  0x10   :  { %v49_v50 = vld [vmem:[%s1071_s0 + $0x68] sm:$0xff]  ;;  %739 = vmatprep.subr.bf16.mxu0 %v388_v44  ;;  %v82_v53 = vpack.c.bf16 %v73_v48, %v72_v47  ;;  %v75_v56 = vld [vmem:[%s1072_s1 + $0x78] sm:$0xff]  ;;  %v50_v57 = vld [vmem:[%s1071_s0 + $0x70] sm:$0xff]  ;;  %s783_s19 = scalar_lea.vmem %s630_s8, 16  ;;  %s787_s5 = scalar_lea.vmem %s630_s8, 32 }
  0x11   :  { %v58_v54 = vpack.c.bf16 %v49_v50, %v48_v49  ;;  %v51_v58 = vld [vmem:[%s1071_s0 + $0x78] sm:$0xff]  ;;  %v83_v59 = vpack.c.bf16 %v75_v56, %v74_v55  ;;  %v1000_v5 = vld [vmem:[%s1075_s4] ss:$0 sm:$0xff]  ;;  %p784_p0 = scmp.ne.s32.totalorder %s630_s8, %s783_s19  ;;  %p788_p1 = scmp.lt.s32.totalorder %s630_s8, %s630_s8 }
  0x12   :  { %708 = vmatmul.mubr.msk.bf16.gmra.mxu0 %vm89_vm1, %v79_v33  ;;  %v59_v60 = vpack.c.bf16 %v51_v58, %v50_v57  ;;  %p789_p2 = scmp.lt.s32.totalorder %s787_s5, %s783_s19 }
  0x13   :  { %726 = vmatmul.mubr.msk.bf16.gmra.mxu1 %vm215_vm2, %v55_v34  ;;  %711 = vmatprep.mubr.msk.bf16.mxu0 %vm89_vm1, %v80_v36 }
  0x14   :  { %729 = vmatprep.mubr.msk.bf16.mxu1 %vm215_vm2, %v56_v37  ;;  %740 = vmatpush3.bf16.msra.mxu0 %v388_v44  ;;  %p790_p3 = por %p789_p2, %p788_p1 }
  0x16   :  { %p791_p4 = pnand %p790_p3, %p784_p0 }
  0x1a   :  { %712 = vmatmul.mubr.msk.bf16.gmra.mxu0 %vm89_vm1, %v81_v51 }
  0x1b   :  { %730 = vmatmul.mubr.msk.bf16.gmra.mxu1 %vm215_vm2, %v57_v52  ;;  %715 = vmatprep.mubr.msk.bf16.mxu0 %vm89_vm1, %v82_v53 }
  0x1c   :  { %733 = vmatprep.mubr.msk.bf16.mxu1 %vm215_vm2, %v58_v54 }
  0x22   :  { %716 = vmatmul.mubr.msk.bf16.gmra.mxu0 %vm89_vm1, %v83_v59 }
  0x23   :  { %734 = vmatmul.mubr.msk.bf16.gmra.mxu1 %vm215_vm2, %v59_v60 }
  0xca   :  { %v705_v61 = vpop.f32.mrf.mxu0 }
  0xcb   :  { %v723_v62 = vpop.f32.mrf.mxu1 }
  0xcc   :  { %v152_v63 = vpop.f32.mrf.mxu0  ;;  %v283_v2 = vadd.f32 %v723_v62, %v705_v61 }
  0xcd   :  { %v274_v0 = vpop.f32.mrf.mxu1 }
  0xce   :  { %v275_v1 = vadd.f32 %v274_v0, %v152_v63  ;;  %v706_v3 = vpop.f32.mrf.mxu0  ;;  %v346_v12 = vadd.f32 %v1000_v5, %v283_v2 }
  0xcf   :  { %v724_v4 = vpop.f32.mrf.mxu1 }
  0xd0   :  { %v286_v6 = vadd.f32 %v724_v4, %v706_v3  ;;  %v155_v7 = vpop.f32.mrf.mxu0  ;;  %v344_v9 = vadd.f32 %v1000_v5, %v275_v1  ;;  %v362_v22 = vmax.f32 %v346_v12, 0.0 }
  0xd1   :  { %v277_v8 = vpop.f32.mrf.mxu1 }
  0xd2   :  { %v347_v10 = vadd.f32 %v1000_v5, %v286_v6  ;;  %v278_v11 = vadd.f32 %v277_v8, %v155_v7  ;;  %v709_v13 = vpop.f32.mrf.mxu0  ;;  %v360_v19 = vmax.f32 %v344_v9, 0.0 }
  0xd3   :  { %v727_v14 = vpop.f32.mrf.mxu1 }
  0xd4   :  { %v345_v15 = vadd.f32 %v1000_v5, %v278_v11  ;;  %v363_v16 = vmax.f32 %v347_v10, 0.0  ;;  %v168_v17 = vpop.f32.mrf.mxu0  ;;  %v299_v23 = vadd.f32 %v727_v14, %v709_v13 }
  0xd5   :  { %v290_v18 = vpop.f32.mrf.mxu1 }
  0xd6   :  { %v361_v20 = vmax.f32 %v345_v15, 0.0  ;;  %v291_v21 = vadd.f32 %v290_v18, %v168_v17  ;;  %v710_v24 = vpop.f32.mrf.mxu0  ;;  %v377_v28 = vpack.c.bf16 %v363_v16, %v362_v22  ;;  %v350_v34 = vadd.f32 %v1000_v5, %v299_v23 }
  0xd7   :  { %v728_v25 = vpop.f32.mrf.mxu1  ;;  %v805_v23 = vmov 0.0  }
  0xd8   :  { %v376_v26 = vpack.c.bf16 %v361_v20, %v360_v19  ;;  %v302_v27 = vadd.f32 %v728_v25, %v710_v24  ;;  %v171_v29 = vpop.f32.mrf.mxu0  ;;  %v348_v31 = vadd.f32 %v1000_v5, %v291_v21  ;;  %v366_v44 = vmax.f32 %v350_v34, 0.0  ;;  %757 = vmatprep.subr.bf16.mxu1 %v805_v23  ;;  %773 = vmatprep.mubr.msk.bf16.mxu1 %vm806_vm4, %v805_v23  ;;  %v545_v24 = vld [vmem:[#allocation2] sm:$0x1] }
  0xd9   :  { %v293_v30 = vpop.f32.mrf.mxu1  ;;  %v807_v25 = vmov 0  }
  0xda   :  { %v351_v32 = vadd.f32 %v1000_v5, %v302_v27  ;;  %v294_v33 = vadd.f32 %v293_v30, %v171_v29  ;;  %741 = vmatprep.mubr.msk.bf16.mxu0 %vm397_vm3, %v376_v26  ;;  %v713_v35 = vpop.f32.mrf.mxu0  ;;  %v364_v41 = vmax.f32 %v348_v31, 0.0  ;;  %782 = vset.pattern.permute.xlu0 %v807_v25  ;;  %v1031_v26 = vld [vmem:[%s1077_s6] ss:$0 sm:$0xff] }
  0xdb   :  { %v731_v36 = vpop.f32.mrf.mxu1  ;;  %742 = vmatmul.mubr.msk.bf16.vlgmr.msra.gmra.mxu0 %vm397_vm3, %v377_v28  ;;  %548 = vperm.xlu0 %782, %v545_v24  }
  0xdc   :  { %v349_v37 = vadd.f32 %v1000_v5, %v294_v33  ;;  %v367_v38 = vmax.f32 %v351_v32, 0.0  ;;  %v184_v39 = vpop.f32.mrf.mxu0  ;;  %v315_v45 = vadd.f32 %v731_v36, %v713_v35 }
  0xdd   :  { %v306_v40 = vpop.f32.mrf.mxu1 }
  0xde   :  { %v365_v42 = vmax.f32 %v349_v37, 0.0  ;;  %v307_v43 = vadd.f32 %v306_v40, %v184_v39  ;;  %v714_v46 = vpop.f32.mrf.mxu0  ;;  %v379_v50 = vpack.c.bf16 %v367_v38, %v366_v44  ;;  %v354_v56 = vadd.f32 %v1000_v5, %v315_v45 }
  0xdf   :  { %v732_v47 = vpop.f32.mrf.mxu1 }
  0xe0   :  { %v378_v48 = vpack.c.bf16 %v365_v42, %v364_v41  ;;  %v318_v49 = vadd.f32 %v732_v47, %v714_v46  ;;  %v187_v51 = vpop.f32.mrf.mxu0  ;;  %v352_v53 = vadd.f32 %v1000_v5, %v307_v43  ;;  %v370_v2 = vmax.f32 %v354_v56, 0.0 }
  0xe1   :  { %v309_v52 = vpop.f32.mrf.mxu1 }
  0xe2   :  { %v355_v54 = vadd.f32 %v1000_v5, %v318_v49  ;;  %v310_v55 = vadd.f32 %v309_v52, %v187_v51  ;;  %745 = vmatprep.mubr.msk.bf16.mxu0 %vm397_vm3, %v378_v48  ;;  %v717_v57 = vpop.f32.mrf.mxu0  ;;  %v368_v63 = vmax.f32 %v352_v53, 0.0 }
  0xe3   :  { %v735_v58 = vpop.f32.mrf.mxu1  ;;  %746 = vmatmul.mubr.msk.bf16.gmra.mxu0 %vm397_vm3, %v379_v50 }
  0xe4   :  { %v353_v59 = vadd.f32 %v1000_v5, %v310_v55  ;;  %v371_v60 = vmax.f32 %v355_v54, 0.0  ;;  %v200_v61 = vpop.f32.mrf.mxu0  ;;  %v331_v3 = vadd.f32 %v735_v58, %v717_v57 }
  0xe5   :  { %v322_v62 = vpop.f32.mrf.mxu1 }
  0xe6   :  { %v369_v0 = vmax.f32 %v353_v59, 0.0  ;;  %v323_v1 = vadd.f32 %v322_v62, %v200_v61  ;;  %v718_v4 = vpop.f32.mrf.mxu0  ;;  %v381_v9 = vpack.c.bf16 %v371_v60, %v370_v2  ;;  %v358_v15 = vadd.f32 %v1000_v5, %v331_v3 }
  0xe7   :  { %v736_v6 = vpop.f32.mrf.mxu1 }
  0xe8   :  { %v380_v7 = vpack.c.bf16 %v369_v0, %v368_v63  ;;  %v334_v8 = vadd.f32 %v736_v6, %v718_v4  ;;  %v203_v10 = vpop.f32.mrf.mxu0  ;;  %v356_v12 = vadd.f32 %v1000_v5, %v323_v1  ;;  %v374_v20 = vmax.f32 %v358_v15, 0.0 }
  0xe9   :  { %v325_v11 = vpop.f32.mrf.mxu1 }
  0xea   :  { %v359_v13 = vadd.f32 %v1000_v5, %v334_v8  ;;  %v326_v14 = vadd.f32 %v325_v11, %v203_v10  ;;  %749 = vmatprep.mubr.msk.bf16.mxu0 %vm397_vm3, %v380_v7  ;;  %v372_v18 = vmax.f32 %v356_v12, 0.0 }
  0xeb   :  { %750 = vmatmul.mubr.msk.bf16.gmra.mxu0 %vm397_vm3, %v381_v9 }
  0xec   :  { %v357_v16 = vadd.f32 %v1000_v5, %v326_v14  ;;  %v375_v17 = vmax.f32 %v359_v13, 0.0 }
  0xee   :  { %v373_v19 = vmax.f32 %v357_v16, 0.0  ;;  %v383_v22 = vpack.c.bf16 %v375_v17, %v374_v20 }
  0xf0   :  { %v382_v21 = vpack.c.bf16 %v373_v19, %v372_v18 }
  0xf2   :  { %753 = vmatprep.mubr.msk.bf16.mxu0 %vm397_vm3, %v382_v21 }
  0xf3   :  { %754 = vmatmul.mubr.msk.bf16.gmra.mxu0 %vm397_vm3, %v383_v22 }
 0x19b   :  { %v743_v5 = vpop.f32.mrf.mxu0 }
 0x19c   :  { %v465_v28 = vadd.f32 %v743_v5, %v1031_v26 }
 0x19d   :  { %v456_v27 = vpop.f32.mrf.mxu0 }
 0x19e   :  { %v457_v30 = vadd.f32 %v1031_v26, %v456_v27  ;;  %v521_v33 = vmax.f32 %v465_v28, 0.0  ;;  %v535_v27 = vld [vmem:[%s1078_s7] sm:$0x1] }
 0x19f   :  { %v744_v29 = vpop.f32.mrf.mxu0  ;;  %v536_v28 = vpack.c.bf16 %v535_v27, %v535_v27 }
 0x1a0   :  { %v468_v31 = vadd.f32 %v744_v29, %v1031_v26  ;;  %v519_v37 = vmax.f32 %v457_v30, 0.0  ;;  %v551_v29 = vlaneseq }
 0x1a1   :  { %v459_v32 = vpop.f32.mrf.mxu0 }
 0x1a2   :  { %v522_v34 = vmax.f32 %v468_v31, 0.0  ;;  %v460_v35 = vadd.f32 %v1031_v26, %v459_v32  ;;  %v552_v30 = vshrl.u32 %v551_v29, 7  ;;  %v549_v32 = vpop.permute.xlu0 %548 }
 0x1a3   :  { %v747_v36 = vpop.f32.mrf.mxu0 }
 0x1a4   :  { %v538_v38 = vpack.c.bf16 %v522_v34, %v521_v33  ;;  %v520_v39 = vmax.f32 %v460_v35, 0.0  ;;  %v481_v13 = vadd.f32 %v747_v36, %v1031_v26  ;;  %v553_v31 = vsub.s32 0, %v552_v30 }
 0x1a5   :  { %v472_v40 = vpop.f32.mrf.mxu0 }
 0x1a6   :  { %v537_v41 = vpack.c.bf16 %v520_v39, %v519_v37  ;;  %v525_v16 = vmax.f32 %v481_v13, 0.0  ;;  %v473_v19 = vadd.f32 %v1031_v26, %v472_v40  ;;  %v562_v5 = vsel %vm397_vm3, %v538_v38, 0 }
 0x1a7   :  { %v748_v42 = vpop.f32.mrf.mxu0  ;;  %v554_v33 = vrot.slane %v549_v32, %v553_v31 }
 0x1a8   :  { %v484_v11 = vadd.f32 %v748_v42, %v1031_v26  ;;  %v523_v22 = vmax.f32 %v473_v19, 0.0 }
 0x1a9   :  { %v475_v43 = vpop.f32.mrf.mxu0 }
 0x1aa   :  { %v526_v14 = vmax.f32 %v484_v11, 0.0  ;;  %v476_v18 = vadd.f32 %v1031_v26, %v475_v43 }
 0x1ab   :  { %v751_v44 = vpop.f32.mrf.mxu0 }
 0x1ac   :  { %v497_v0 = vadd.f32 %v751_v44, %v1031_v26  ;;  %v540_v17 = vpack.c.bf16 %v526_v14, %v525_v16  ;;  %v524_v20 = vmax.f32 %v476_v18, 0.0 }
 0x1ad   :  { %v488_v45 = vpop.f32.mrf.mxu0 }
 0x1ae   :  { %v529_v3 = vmax.f32 %v497_v0, 0.0  ;;  %v489_v7 = vadd.f32 %v1031_v26, %v488_v45  ;;  %v568_v21 = vsel %vm397_vm3, %v540_v17, 0  ;;  %v539_v24 = vpack.c.bf16 %v524_v20, %v523_v22 }
 0x1af   :  { %v752_v46 = vpop.f32.mrf.mxu0 }
 0x1b0   :  { %v500_v62 = vadd.f32 %v752_v46, %v1031_v26  ;;  %v527_v10 = vmax.f32 %v489_v7, 0.0  ;;  %v565_v25 = vsel %vm397_vm3, %v539_v24, 0 }
 0x1b1   :  { %v491_v47 = vpop.f32.mrf.mxu0 }
 0x1b2   :  { %v530_v1 = vmax.f32 %v500_v62, 0.0  ;;  %v492_v6 = vadd.f32 %v1031_v26, %v491_v47 }
 0x1b3   :  { %v755_v48 = vpop.f32.mrf.mxu0 }
 0x1b4   :  { %v513_v50 = vadd.f32 %v755_v48, %v1031_v26  ;;  %v542_v4 = vpack.c.bf16 %v530_v1, %v529_v3  ;;  %v528_v8 = vmax.f32 %v492_v6, 0.0 }
 0x1b5   :  { %v504_v49 = vpop.f32.mrf.mxu0 }
 0x1b6   :  { %v533_v54 = vmax.f32 %v513_v50, 0.0  ;;  %v505_v57 = vadd.f32 %v1031_v26, %v504_v49  ;;  %v574_v9 = vsel %vm397_vm3, %v542_v4, 0  ;;  %v541_v12 = vpack.c.bf16 %v528_v8, %v527_v10 }
 0x1b7   :  { %v756_v51 = vpop.f32.mrf.mxu0 }
 0x1b8   :  { %v516_v52 = vadd.f32 %v756_v51, %v1031_v26  ;;  %v531_v61 = vmax.f32 %v505_v57, 0.0  ;;  %v571_v15 = vsel %vm397_vm3, %v541_v12, 0 }
 0x1b9   :  { %v507_v53 = vpop.f32.mrf.mxu0 }
 0x1ba   :  { %v534_v55 = vmax.f32 %v516_v52, 0.0  ;;  %v508_v56 = vadd.f32 %v1031_v26, %v507_v53  ;;  %v559_v26 = vsel %vm397_vm3, %v537_v41, 0 }
 0x1bc   :  { %v544_v58 = vpack.c.bf16 %v534_v55, %v533_v54  ;;  %v532_v59 = vmax.f32 %v508_v56, 0.0 }
 0x1be   :  { %v580_v60 = vsel %vm397_vm3, %v544_v58, 0  ;;  %v543_v63 = vpack.c.bf16 %v532_v59, %v531_v61 }
 0x1bf   :  { %758 = vmatpush3.bf16.xpose.msra.mxu1 %v580_v60 }
 0x1c0   :  { %759 = vmatprep.subr.bf16.mxu1 %v805_v23  ;;  %v577_v2 = vsel %vm397_vm3, %v543_v63, 0 }
 0x1c7   :  { %760 = vmatpush3.bf16.xpose.msra.mxu1 %v577_v2 }
 0x1c8   :  { %761 = vmatprep.subr.bf16.mxu1 %v805_v23 }
 0x1cf   :  { %762 = vmatpush3.bf16.xpose.msra.mxu1 %v574_v9 }
 0x1d0   :  { %763 = vmatprep.subr.bf16.mxu1 %v805_v23 }
 0x1d7   :  { %764 = vmatpush3.bf16.xpose.msra.mxu1 %v571_v15 }
 0x1d8   :  { %765 = vmatprep.subr.bf16.mxu1 %v805_v23 }
 0x1df   :  { %766 = vmatpush3.bf16.xpose.msra.mxu1 %v568_v21 }
 0x1e0   :  { %767 = vmatprep.subr.bf16.mxu1 %v805_v23 }
 0x1e7   :  { %768 = vmatpush3.bf16.xpose.msra.mxu1 %v565_v25 }
 0x1e8   :  { %769 = vmatprep.subr.bf16.mxu1 %v805_v23 }
 0x1ef   :  { %770 = vmatpush3.bf16.xpose.msra.mxu1 %v562_v5 }
 0x1f0   :  { %771 = vmatprep.subr.bf16.mxu1 %v805_v23 }
 0x1f7   :  { %772 = vmatpush3.bf16.xpose.msra.mxu1 %v559_v26 }
 0x1fe   :  { %774 = vmatmul.mubr.msk.bf16.vlgmr.msra.gmra.mxu1 %vm397_vm3, %v536_v28 }
 0x2be   :  { %v616_v34 = vpop.f32.mrf.mxu1 }
 0x2bf   :  { %v617_v35 = vadd.f32 %v616_v34, %v554_v33 }
 0x2c0   :  { %v775_v23 = vpop.f32.mrf.mxu1 }
 0x2c1   :  { %622 = vst [vmem:[#allocation3] sm:$0x1] %v617_v35 }
 0x2c2   :  { %v619_v36 = vpop.f32.mrf.mxu1 }
 0x2c3   :  { %794 = shalt.err (!%p791_p4)
}
 0x2c4   :  { %632 = dma.vmem_to_hbm [thread:$0]  %s630_s8, 16, %s1080_s9, [#allocation4]   ;;  %v776_v37 = vpop.f32.mrf.mxu1 }
 0x2c5   :  { %803 = dma.done.wait [#allocation4], 16  }
 0x2c6   :  { %804 = vsyncadd [#allocation4], 4294967280 }
 0x2c7   :  { %636 = vsyncpa [#allocation4], 1 }

</bundles_post_ra>
